<compile_context>
chip_gen: v7x
topology: tpu7x:2x2x1
jax: 0.10.0
libtpu: 0.0.40
codegen_flags: <defaults>
</compile_context>

<pallas_src>
import jax
import jax.numpy as jnp
from jax.experimental import pallas as pl
from jax.experimental.pallas import tpu as pltpu

_LANES = 128        # vreg lane width (last dim)
_SUBLANES = 8       # vreg sublane count (second-last dim)
_BLOCK_ROWS = 2048  # (2048, 128) f32 block = 1 MiB per input per grid step


def _exp_loss_kernel(y_ref, lamb_ref, out_ref, acc_ref):
    """Accumulate sum(lamb*y - log(lamb)) into an (8,128) VMEM accumulator."""
    k = pl.program_id(0)

    @pl.when(k == 0)
    def _():
        acc_ref[...] = jnp.zeros_like(acc_ref)

    y = y_ref[...]        # (block_rows, 128) f32
    lamb = lamb_ref[...]  # (block_rows, 128) f32
    # VPU mul/sub fused with the EUP log in a single pass over the block.
    contrib = lamb * y - jnp.log(lamb)
    # Fold the block's rows down onto the 8 vreg sublanes: elementwise VPU
    # adds only — no per-step XLU cross-lane reduction on the critical path.
    acc_ref[...] += jnp.sum(contrib.reshape(-1, _SUBLANES, _LANES), axis=0)

    @pl.when(k == pl.num_programs(0) - 1)
    def _():
        # Single cross-lane/sublane reduce at the very end.
        out_ref[...] = jnp.sum(acc_ref[...], keepdims=True)


def exponential_loss(y, lamb, *, block_rows=_BLOCK_ROWS):
    """Pallas implementation of ExponentialLoss.forward(y, lamb) -> scalar.

    Returns  sum_i ( lamb[i] * y[i] - log(lamb[i]) )  ==  -loss.
    """
    assert y.shape == lamb.shape and y.ndim == 1
    assert block_rows % _SUBLANES == 0
    n = y.shape[0]
    y = y.astype(jnp.float32)
    lamb = lamb.astype(jnp.float32)

    block_elems = block_rows * _LANES
    if n <= block_elems:
        # Small input: single grid step, smallest sublane-aligned covering block.
        block_rows = max(
            _SUBLANES, pl.cdiv(pl.cdiv(n, _LANES), _SUBLANES) * _SUBLANES
        )
    rows = pl.cdiv(n, block_rows * _LANES) * block_rows

    n_pad = rows * _LANES
    pad = n_pad - n
    if pad:
        # Pad only the tail: y=0, lamb=1 contributes exactly 0 to the loss
        # (lamb must be 1, not 0, so log() stays finite).
        y = jnp.pad(y, (0, pad), constant_values=0.0)
        lamb = jnp.pad(lamb, (0, pad), constant_values=1.0)

    # Sample axis folded onto a sublane-dense (rows, 128) 2-D layout.
    y2 = y.reshape(rows, _LANES)
    lamb2 = lamb.reshape(rows, _LANES)

    out = pl.pallas_call(
        _exp_loss_kernel,
        out_shape=jax.ShapeDtypeStruct((1, 1), jnp.float32),
        grid_spec=pltpu.PrefetchScalarGridSpec(
            num_scalar_prefetch=0,
            grid=(rows // block_rows,),
            in_specs=[
                pl.BlockSpec((block_rows, _LANES), lambda k: (k, 0)),
                pl.BlockSpec((block_rows, _LANES), lambda k: (k, 0)),
            ],
            out_specs=pl.BlockSpec((1, 1), lambda k: (0, 0)),
            scratch_shapes=[pltpu.VMEM((_SUBLANES, _LANES), jnp.float32)],
        ),
        compiler_params=pltpu.CompilerParams(
            dimension_semantics=("arbitrary",),  # reduction axis
        ),
    )(y2, lamb2)

    return out[0, 0]


if __name__ == "__main__":
    key = jax.random.PRNGKey(0)
    ky, kl = jax.random.split(key)

    # Small-shape case (matches the 1-D y / lamb of the PyTorch module):
    # collapses to a single (8, 128) block / single grid step.
    N = 8
    y = jax.random.uniform(ky, (N,), dtype=jnp.float32, minval=0.0, maxval=2.0)
    lamb = jax.random.uniform(kl, (N,), dtype=jnp.float32, minval=0.5, maxval=3.0)

    result = exponential_loss(y, lamb)
    jax.block_until_ready(result)

    ref = -jnp.sum(jnp.log(lamb) - lamb * y)
    assert jnp.allclose(result, ref, rtol=1e-5, atol=1e-5), (result, ref)

    # Also exercise the multi-step tiled path (grid > 1, tail padding) at a
    # small size by shrinking the block for this check only.
    N2 = 2000
    y2 = jax.random.uniform(ky, (N2,), dtype=jnp.float32, minval=0.0, maxval=2.0)
    lamb2 = jax.random.uniform(kl, (N2,), dtype=jnp.float32, minval=0.5, maxval=3.0)
    result2 = exponential_loss(y2, lamb2, block_rows=8)
    jax.block_until_ready(result2)
    ref2 = jnp.sum(lamb2 * y2 - jnp.log(lamb2))
    assert jnp.allclose(result2, ref2, rtol=1e-4, atol=1e-3), (result2, ref2)

    print("KERNEL_OK")
</pallas_src>

<mosaic_0001>
module attributes {stable_mosaic.version = 11 : i64} {
  func.func @_exp_loss_kernel(%arg0: i32, %arg1: memref<8x128xf32, #tpu.memory_space<vmem>>, %arg2: memref<8x128xf32, #tpu.memory_space<vmem>>, %arg3: memref<1x1xf32, #tpu.memory_space<vmem>>, %arg4: memref<8x128xf32, #tpu.memory_space<vmem>>) attributes {dimension_semantics = [#tpu.dimension_semantics<arbitrary>], iteration_bounds = array<i64: 1>, scalar_prefetch = 0 : i64, scratch_operands = 1 : i64, tpu.core_type = #tpu.core_type<tc>, window_params = [{transform_indices = @transform_0, window_bounds = array<i64: 8, 128>}, {transform_indices = @transform_1, window_bounds = array<i64: 8, 128>}, {pipeline_mode = #tpu.pipeline_mode<synchronous>, transform_indices = @transform_2, window_bounds = array<i64: 1, 1>}]} {
    %c0_i32 = arith.constant 0 : i32
    %0 = arith.cmpi eq, %arg0, %c0_i32 : i32
    %1 = arith.extui %0 : i1 to i32
    %c0_i32_0 = arith.constant 0 : i32
    %2 = arith.cmpi ne, %1, %c0_i32_0 : i32
    scf.if %2 {
      %cst_10 = arith.constant 0.000000e+00 : f32
      %16 = vector.broadcast %cst_10 : f32 to vector<8x128xf32>
      %c0_11 = arith.constant 0 : index
      %c0_12 = arith.constant 0 : index
      %17 = vector.load %arg4[%c0_11, %c0_12] : memref<8x128xf32, #tpu.memory_space<vmem>>, vector<8x128xf32>
      tpu.vector_store %arg4[%c0_11, %c0_12], %16 {strides = array<i32>} : memref<8x128xf32, #tpu.memory_space<vmem>>, vector<8x128xf32>,
    } else {
    }
    %c0 = arith.constant 0 : index
    %c0_1 = arith.constant 0 : index
    %3 = vector.load %arg1[%c0, %c0_1] : memref<8x128xf32, #tpu.memory_space<vmem>>, vector<8x128xf32>
    %c0_2 = arith.constant 0 : index
    %c0_3 = arith.constant 0 : index
    %4 = vector.load %arg2[%c0_2, %c0_3] : memref<8x128xf32, #tpu.memory_space<vmem>>, vector<8x128xf32>
    %5 = arith.mulf %4, %3 : vector<8x128xf32>
    %6 = math.log %4 : vector<8x128xf32>
    %7 = arith.subf %5, %6 : vector<8x128xf32>
    %c0_4 = arith.constant 0 : index
    %c0_5 = arith.constant 0 : index
    %8 = vector.load %arg4[%c0_4, %c0_5] : memref<8x128xf32, #tpu.memory_space<vmem>>, vector<8x128xf32>
    %9 = vector.shape_cast %7 : vector<8x128xf32> to vector<1x8x128xf32>
    %cst = arith.constant dense<0.000000e+00> : vector<8x128xf32>
    %10 = vector.multi_reduction <add>, %9, %cst [0] : vector<1x8x128xf32> to vector<8x128xf32>
    %11 = arith.addf %8, %10 : vector<8x128xf32>
    %c0_6 = arith.constant 0 : index
    %c0_7 = arith.constant 0 : index
    %12 = vector.load %arg4[%c0_6, %c0_7] : memref<8x128xf32, #tpu.memory_space<vmem>>, vector<8x128xf32>
    tpu.vector_store %arg4[%c0_6, %c0_7], %11 {strides = array<i32>} : memref<8x128xf32, #tpu.memory_space<vmem>>, vector<8x128xf32>,
    %c0_i32_8 = arith.constant 0 : i32
    %13 = arith.cmpi eq, %arg0, %c0_i32_8 : i32
    %14 = arith.extui %13 : i1 to i32
    %c0_i32_9 = arith.constant 0 : i32
    %15 = arith.cmpi ne, %14, %c0_i32_9 : i32
    scf.if %15 {
      %c0_10 = arith.constant 0 : index
      %c0_11 = arith.constant 0 : index
      %16 = vector.load %arg4[%c0_10, %c0_11] : memref<8x128xf32, #tpu.memory_space<vmem>>, vector<8x128xf32>
      %17 = vector.shape_cast %16 : vector<8x128xf32> to vector<1x8x128xf32>
      %cst_12 = arith.constant dense<0.000000e+00> : vector<1xf32>
      %18 = vector.multi_reduction <add>, %17, %cst_12 [1, 2] : vector<1x8x128xf32> to vector<1xf32>
      %19 = vector.shape_cast %18 : vector<1xf32> to vector<1x1x1xf32>
      %20 = vector.extract %19[0, 0, 0] : f32 from vector<1x1x1xf32>
      %21 = vector.broadcast %20 : f32 to vector<1x1xf32>
      %c0_13 = arith.constant 0 : index
      %c0_14 = arith.constant 0 : index
      %22 = vector.load %arg3[%c0_13, %c0_14] : memref<1x1xf32, #tpu.memory_space<vmem>>, vector<1x1xf32>
      tpu.vector_store %arg3[%c0_13, %c0_14], %21 {strides = array<i32>} : memref<1x1xf32, #tpu.memory_space<vmem>>, vector<1x1xf32>,
    } else {
    }
    return
  }
  func.func @transform_0(%arg0: i32) -> (i32, i32) {
    %c0_i32 = arith.constant 0 : i32
    %c0_i32_0 = arith.constant 0 : i32
    return %arg0, %c0_i32 : i32, i32
  }
  func.func @transform_1(%arg0: i32) -> (i32, i32) {
    %c0_i32 = arith.constant 0 : i32
    %c0_i32_0 = arith.constant 0 : i32
    return %arg0, %c0_i32 : i32, i32
  }
  func.func @transform_2(%arg0: i32) -> (i32, i32) {
    %c0_i32 = arith.constant 0 : i32
    %c0_i32_0 = arith.constant 0 : i32
    %c0_i32_1 = arith.constant 0 : i32
    return %c0_i32, %c0_i32_0 : i32, i32
  }
}

</mosaic_0001>

<bundles_post_ra>
// kernel: tpu_custom_call.1
= control target key start
LH: loop header
LB: loop body
LE: loop exit
PB: predicated region body
PF: predicated region fallthrough
CT: control target
= control target key end

     0   :  { %7 = vsyncpa [#allocation4], 0  ;;  %s216_s0 = inlined_call_operand.hbm [shape: f32[8,128], index: 0, kind: input, shape index: {}]   ;;  %s217_s1 = inlined_call_operand.hbm [shape: f32[8,128], index: 1, kind: input, shape index: {}]   ;;  %s218_s2 = inlined_call_operand.hbm [shape: f32[1,1], index: 2, kind: output, shape index: {}]  }
   0x1   :  { %8 = vsyncpa [#allocation7], 0 }
   0x2   :  { %9 = vsyncpa [#allocation5], 0  ;;  %s162_s9 = smov [#allocation3]   ;;  %s163_s11 = smov [#allocation6]  }
   0x3   :  { %s16_s10 = sshll.u32 %s162_s9, 4  ;;  %s26_s12 = sshll.u32 %s163_s11, 4  ;;  %s17_s10 = int_to_ptr.vmem [resolvable:$true] %s16_s10  ;;  %s27_s12 = int_to_ptr.vmem [resolvable:$true] %s26_s12 }
   0x4   :  { %s90_s15 = scalar_lea.hbm %s216_s0, 128 }
   0x5   :  { %p91_p0 = scmp.ne.s32.totalorder %s216_s0, %s90_s15  ;;  %p94_p1 = scmp.lt.u32.totalorder %s90_s15, %s216_s0 }
   0x7   :  { %p96_p2 = pnand %p94_p1, %p91_p0 }
   0x9   :  { %99 = shalt.err (!%p96_p2)
}
   0xa   :  { %s100_s20 = scalar_lea.vmem %s17_s10, 128  ;;  %p105_p4 = scmp.lt.s32.totalorder %s17_s10, %s17_s10 }
   0xb   :  { %p101_p3 = scmp.ne.s32.totalorder %s17_s10, %s100_s20  ;;  %p106_p5 = scmp.lt.s32.totalorder %s100_s20, %s100_s20 }
   0xd   :  { %p107_p6 = por %p106_p5, %p105_p4 }
   0xf   :  { %p108_p7 = pnand %p107_p6, %p101_p3 }
  0x11   :  { %111 = shalt.err (!%p108_p7)
}
  0x12   :  { %19 = dma.hbm_to_vmem [thread:$0]  %s216_s0, 128, %s17_s10, [#allocation4]  }
  0x13   :  { %s112_s25 = scalar_lea.hbm %s217_s1, 128 }
  0x14   :  { %p113_p8 = scmp.ne.s32.totalorder %s217_s1, %s112_s25  ;;  %p116_p9 = scmp.lt.u32.totalorder %s112_s25, %s217_s1 }
  0x16   :  { %p118_p10 = pnand %p116_p9, %p113_p8 }
  0x18   :  { %121 = shalt.err (!%p118_p10)
}
  0x19   :  { %s122_s30 = scalar_lea.vmem %s27_s12, 128  ;;  %p127_p12 = scmp.lt.s32.totalorder %s27_s12, %s27_s12 }
  0x1a   :  { %p123_p11 = scmp.ne.s32.totalorder %s27_s12, %s122_s30  ;;  %p128_p13 = scmp.lt.s32.totalorder %s122_s30, %s122_s30 }
  0x1c   :  { %p129_p0 = por %p128_p13, %p127_p12 }
  0x1e   :  { %p130_p1 = pnand %p129_p0, %p123_p11 }
  0x20   :  { %133 = shalt.err (!%p130_p1)
}
  0x21   :  { %29 = dma.hbm_to_vmem [thread:$0]  %s217_s1, 128, %s27_s12, [#allocation7]  }
  0x22   :  { %156 = dma.done.wait [#allocation4], 128  }
  0x23   :  { %157 = vsyncadd [#allocation4], 4294967168 }
  0x24   :  { %158 = dma.done.wait [#allocation7], 128  }
  0x25   :  { %159 = vsyncadd [#allocation7], 4294967168  ;;  %v42_v0 = vld [vmem:[#allocation6] sm:$0xff]  ;;  %v41_v1 = vld [vmem:[#allocation3] sm:$0xff]  ;;  %s164_s1 = smov [#allocation8]   ;;  %vm65_vm0 = vcmask 0  }
  0x26   :  { %88 = vlog2.f32 %v42_v0  ;;  %v43_v2 = vmul.f32 %v42_v0, %v41_v1  ;;  %s73_s4 = sshll.u32 %s164_s1, 4  ;;  %s74_s4 = int_to_ptr.vmem [resolvable:$true] %s73_s4 }
  0x27   :  { %s134_s6 = scalar_lea.vmem %s74_s4, 16  ;;  %s138_s7 = scalar_lea.vmem %s74_s4, 32 }
  0x28   :  { %p135_p2 = scmp.ne.s32.totalorder %s74_s4, %s134_s6  ;;  %p139_p3 = scmp.lt.s32.totalorder %s74_s4, %s74_s4 }
  0x29   :  { %p140_p4 = scmp.lt.s32.totalorder %s138_s7, %s134_s6 }
  0x2b   :  { %p141_p5 = por %p140_p4, %p139_p3 }
  0x2d   :  { %p142_p6 = pnand %p141_p5, %p135_p2 }
  0x30   :  { %v89_v3 = vpop.eup %88 }
  0x31   :  { %v45_v4 = vmul.f32 0.6931472, %v89_v3 }
  0x33   :  { %v46_v5 = vsub.f32 %v43_v2, %v45_v4 }
  0x35   :  { %55 = vadd.xlane.f32.xlu0 %v46_v5 }
  0xc2   :  { %v56_v6 = vpop.xlane.xlu0 %55 }
  0xc3   :  { %v57_v7 = vrot.slane %v56_v6, 4 }
  0xc5   :  { %v58_v8 = vadd.f32 %v57_v7, %v56_v6 }
  0xc7   :  { %v59_v9 = vrot.slane %v58_v8, 2 }
  0xc9   :  { %v60_v10 = vadd.f32 %v59_v9, %v58_v8 }
  0xcb   :  { %v61_v11 = vrot.slane %v60_v10, 1 }
  0xcd   :  { %v62_v12 = vadd.f32 %v61_v11, %v60_v10 }
  0xcf   :  { %83 = vpush %v62_v12 }
 0x100   :  { %s84_s5 = spop %83 }
 0x101   :  { %v64_v13 = vstv %s84_s5 }
 0x102   :  { %66 = vst.msk [vmem:[#allocation8] sm:$0x1] %vm65_vm0, %v64_v13 }
 0x103   :  { %145 = shalt.err (!%p142_p6)
}
 0x104   :  { %s146_s10 = scalar_lea.hbm %s218_s2, 16 }
 0x105   :  { %p147_p7 = scmp.ne.s32.totalorder %s218_s2, %s146_s10  ;;  %p150_p8 = scmp.lt.u32.totalorder %s146_s10, %s218_s2 }
 0x107   :  { %p152_p9 = pnand %p150_p8, %p147_p7 }
 0x109   :  { %155 = shalt.err (!%p152_p9)
}
 0x10a   :  { %76 = dma.vmem_to_hbm [thread:$0]  %s74_s4, 16, %s218_s2, [#allocation5]  }
 0x10b   :  { %160 = dma.done.wait [#allocation5], 16  }
 0x10c   :  { %161 = vsyncadd [#allocation5], 4294967280 }
 0x10d   :  { %80 = vsyncpa [#allocation4], 1 }
 0x10e   :  { %81 = vsyncpa [#allocation7], 1 }
 0x10f   :  { %82 = vsyncpa [#allocation5], 1 }

</bundles_post_ra>
